<compile_context>
chip_gen: v7x
topology: tpu7x:2x2x1
jax: 0.10.0
libtpu: 0.0.40
codegen_flags: <defaults>
</compile_context>

<pallas_src>
import numpy as np
import jax
import jax.numpy as jnp
from jax import lax
from jax.experimental import pallas as pl
from jax.experimental.pallas import tpu as pltpu

# ------------------------- configuration (small) -------------------------
MAX_SOURCE_LENGTH = 8      # L
HIDDEN_SIZE       = 32     # H  (config.hidden_size)
NUM_CLASSES       = 2      # C
VOCAB_SIZE        = 64
PAD_TOKEN_ID      = 0
EOS_TOKEN_ID      = 2
_OUT_LANES        = 128    # lane-dense packed output width: [logits | prob | 0s]


# ------------------------------ Pallas kernel -----------------------------
def _make_clone_head_kernel(TB: int, L: int, H: int, C: int, out_w: int):
    def kernel(eos_ref,                            # VMEM (TB, 2)      int32
               hid_ref,                            # VMEM (TB, 2, L, H) f32
               w1_ref, b1_ref, w2_ref, b2_ref,     # VMEM classifier params
               out_ref):                           # VMEM (TB, out_w)  f32
        hid = hid_ref[...]                         # (TB, 2, L, H)
        eos = eos_ref[...]                         # (TB, 2)

        # ---- last-<eos> row select, entirely in VMEM (one-hot + reduce) ----
        l_iota = lax.broadcasted_iota(jnp.int32, (TB, L), 1)
        sel_e = (l_iota == eos[:, 0:1]).astype(jnp.float32)        # (TB, L)
        sel_o = (l_iota == eos[:, 1:2]).astype(jnp.float32)
        vec_e = jnp.sum(hid[:, 0] * sel_e[:, :, None], axis=1)     # (TB, H)
        vec_o = jnp.sum(hid[:, 1] * sel_o[:, :, None], axis=1)     # (TB, H)

        # ---- RobertaClassificationHead ----
        # x = vec.reshape(-1, 2H);  x @ W1 == vec_e @ W1[:H] + vec_o @ W1[H:]
        dense = (jnp.dot(vec_e, w1_ref[0:H, :],
                         preferred_element_type=jnp.float32)
                 + jnp.dot(vec_o, w1_ref[H:2 * H, :],
                           preferred_element_type=jnp.float32)
                 + b1_ref[...])                                    # (TB, H)
        x = jnp.tanh(dense)
        logits = jnp.dot(x, w2_ref[...],
                         preferred_element_type=jnp.float32) + b2_ref[...]

        # exact softmax over classes (torch softmax default dim for 2-D = 1)
        m = jnp.max(logits, axis=-1, keepdims=True)
        e = jnp.exp(logits - m)
        prob = e / jnp.sum(e, axis=-1, keepdims=True)

        # ---- lane-dense packed output: lanes [0:C)=logits, [C:2C)=prob ----
        lane = lax.broadcasted_iota(jnp.int32, (TB, out_w), 1)
        packed = jnp.zeros((TB, out_w), jnp.float32)
        for j in range(C):                         # C is tiny and static
            packed = jnp.where(lane == j, logits[:, j:j + 1], packed)
            packed = jnp.where(lane == C + j, prob[:, j:j + 1], packed)
        out_ref[...] = packed                      # full-width unmasked store

    return kernel


def _choose_pairs_per_step(B: int, L: int, H: int, *, max_tile: int = 128,
                           block_budget_bytes: int = 8 << 20) -> int:
    """Pairs per grid step: large enough to amortize the ~0.35us step overhead
    and fill the MXU M dimension, <= B//2 so the "parallel" axis can shard
    across v7x's two TensorCores, and small enough that the (TB,2,L,H) f32
    hidden block fits VMEM comfortably on every generation (v7x: 64 MiB)."""
    def fits(tb):
        return 2 * tb * L * H * 4 <= block_budget_bytes
    if B <= 8:
        return B                                    # one step, full-dim blocks
    cap = min(max_tile, B // 2)
    for tb in range(cap, 7, -1):
        if B % tb == 0 and tb % 8 == 0 and fits(tb):
            return tb
    return B                                        # fallback: single step


def clone_head_pallas(last_eos, hidden, w1, b1, w2, b2):
    """last_eos: (N,) int32; hidden: (N, L, H) f32 -> (logits, prob), each (B, C)."""
    N, L, H = hidden.shape
    C = w2.shape[-1]
    assert N % 2 == 0, "clone detection pairs two code snippets per item"
    B = N // 2
    TB = _choose_pairs_per_step(B, L, H)
    assert B % TB == 0

    # free metadata reshapes: pair (even, odd) examples along a size-2 axis
    hidden_pairs = hidden.reshape(B, 2, L, H).astype(jnp.float32)
    eos_pairs = last_eos.reshape(B, 2).astype(jnp.int32)
    out_w = _OUT_LANES

    # TODO(synk): for real CodeT5 dims (L=512, H=768) gather hidden as bf16 to
    # halve HBM->VMEM traffic (upcast after the select on v5e); kept f32 here
    # for exactness at these tiny surrogate dims.
    kernel = _make_clone_head_kernel(TB, L, H, C, out_w)
    grid_spec = pltpu.PrefetchScalarGridSpec(
        num_scalar_prefetch=0,
        grid=(B // TB,),
        in_specs=[
            pl.BlockSpec((TB, 2), lambda i: (i, 0)),              # last-<eos> pos
            pl.BlockSpec((TB, 2, L, H), lambda i: (i, 0, 0, 0)),  # hidden states
            pl.BlockSpec((2 * H, H), lambda i: (0, 0)),           # W1
            pl.BlockSpec((1, H),     lambda i: (0, 0)),           # b1
            pl.BlockSpec((H, C),     lambda i: (0, 0)),           # W2
            pl.BlockSpec((1, C),     lambda i: (0, 0)),           # b2
        ],
        out_specs=pl.BlockSpec((TB, out_w), lambda i: (i, 0)),
    )
    out = pl.pallas_call(
        kernel,
        out_shape=jax.ShapeDtypeStruct((B, out_w), jnp.float32),
        grid_spec=grid_spec,
        compiler_params=pltpu.CompilerParams(
            dimension_semantics=("parallel",)),
    )(eos_pairs, hidden_pairs, w1, b1, w2, b2)
    return out[:, 0:C], out[:, C:2 * C]


# ------------------------------- model glue -------------------------------
def init_params(key):
    k_emb, k_w1, k_b1, k_w2, k_b2 = jax.random.split(key, 5)
    scale = 0.02
    return {
        # TODO(synk): the pretrained CodeT5 encoder-decoder stack is not
        # reproducible in-script; a deterministic embedding-table surrogate
        # stands in for the decoder's last hidden states.
        "emb": scale * jax.random.normal(
            k_emb, (VOCAB_SIZE, HIDDEN_SIZE), jnp.float32),
        # RobertaClassificationHead
        "w1": scale * jax.random.normal(
            k_w1, (2 * HIDDEN_SIZE, HIDDEN_SIZE), jnp.float32),
        "b1": scale * jax.random.normal(k_b1, (1, HIDDEN_SIZE), jnp.float32),
        "w2": scale * jax.random.normal(
            k_w2, (HIDDEN_SIZE, NUM_CLASSES), jnp.float32),
        "b2": scale * jax.random.normal(k_b2, (1, NUM_CLASSES), jnp.float32),
    }


def _last_eos_positions(ids):
    """Position of the last <eos> token per example (falls back to L-1)."""
    L = ids.shape[1]
    pos = jnp.arange(L, dtype=jnp.int32)[None, :]
    last = jnp.max(jnp.where(ids == EOS_TOKEN_ID, pos, -1), axis=1)
    return jnp.where(last >= 0, last, L - 1).astype(jnp.int32)


def clone_model_forward(source_ids, params, labels=None, *, check_eos=False):
    """source_ids: (B, 2*MAX_SOURCE_LENGTH) int32 -> prob (B, 2) [and loss]."""
    ids = source_ids.reshape(-1, MAX_SOURCE_LENGTH)           # (N=2B, L)

    if check_eos:
        # Debug-only (matches torch's ValueError); forces a device->host sync,
        # so it is disabled on the hot path.
        counts = np.asarray(jnp.sum(ids == EOS_TOKEN_ID, axis=1))
        if len(np.unique(counts)) > 1:
            raise ValueError(
                "All examples must have the same number of <eos> tokens.")

    # surrogate decoder hidden states (plain-JAX glue: embedding gather)
    hidden = params["emb"][ids].astype(jnp.float32)           # (N, L, H)
    last_eos = _last_eos_positions(ids)                       # (N,) int32

    logits, prob = clone_head_pallas(
        last_eos, hidden,
        params["w1"], params["b1"], params["w2"], params["b2"])

    if labels is not None:
        log_probs = jax.nn.log_softmax(logits, axis=-1)
        nll = -jnp.take_along_axis(log_probs, labels[:, None], axis=-1)
        loss = jnp.mean(nll)
        return loss, prob
    return prob


# ---------------------------- pure-JAX reference ---------------------------
def reference_forward(source_ids, params):
    ids = source_ids.reshape(-1, MAX_SOURCE_LENGTH)
    hidden = params["emb"][ids]
    last_eos = _last_eos_positions(ids)
    vec = hidden[jnp.arange(ids.shape[0]), last_eos, :]        # (N, H)
    x = vec.reshape(-1, 2 * HIDDEN_SIZE)
    x = jnp.tanh(x @ params["w1"] + params["b1"][0])
    logits = x @ params["w2"] + params["b2"][0]
    return logits, jax.nn.softmax(logits, axis=-1)


# ----------------------------------- main ----------------------------------
if __name__ == "__main__":
    key = jax.random.PRNGKey(0)
    k_params, k_ids, k_lbl = jax.random.split(key, 3)
    params = init_params(k_params)

    B = 16                                                    # clone pairs
    N = 2 * B
    # random token ids in [3, vocab) so pad/eos only appear where we put them
    ids = jax.random.randint(
        k_ids, (N, MAX_SOURCE_LENGTH), 3, VOCAB_SIZE, dtype=jnp.int32)
    # exactly one <eos> per example (last position) -> equal eos counts
    ids = ids.at[:, -1].set(EOS_TOKEN_ID)
    source_ids = ids.reshape(B, 2 * MAX_SOURCE_LENGTH)

    # inference path
    prob = clone_model_forward(source_ids, params)
    prob = jax.block_until_ready(prob)

    # training path (loss)
    labels = jax.random.randint(k_lbl, (B,), 0, NUM_CLASSES, dtype=jnp.int32)
    loss, prob_l = clone_model_forward(source_ids, params, labels=labels)
    jax.block_until_ready((loss, prob_l))

    # correctness vs. pure-JAX reference
    hidden = params["emb"][ids].astype(jnp.float32)
    last_eos = _last_eos_positions(ids)
    logits_k, prob_k = clone_head_pallas(
        last_eos, hidden,
        params["w1"], params["b1"], params["w2"], params["b2"])
    jax.block_until_ready((logits_k, prob_k))
    logits_r, prob_r = reference_forward(source_ids, params)

    np.testing.assert_allclose(np.asarray(logits_k), np.asarray(logits_r),
                               rtol=1e-4, atol=1e-5)
    np.testing.assert_allclose(np.asarray(prob_k), np.asarray(prob_r),
                               rtol=1e-4, atol=1e-5)
    np.testing.assert_allclose(np.asarray(prob), np.asarray(prob_r),
                               rtol=1e-4, atol=1e-5)
    print("KERNEL_OK")
</pallas_src>

<mosaic_0001>
module attributes {stable_mosaic.version = 11 : i64} {
  func.func @kernel(%arg0: i32, %arg1: memref<8x2xi32, #tpu.memory_space<vmem>>, %arg2: memref<8x2x8x32xf32, #tpu.memory_space<vmem>>, %arg3: memref<64x32xf32, #tpu.memory_space<vmem>>, %arg4: memref<1x32xf32, #tpu.memory_space<vmem>>, %arg5: memref<32x2xf32, #tpu.memory_space<vmem>>, %arg6: memref<1x2xf32, #tpu.memory_space<vmem>>, %arg7: memref<8x128xf32, #tpu.memory_space<vmem>>) attributes {dimension_semantics = [#tpu.dimension_semantics<parallel>], iteration_bounds = array<i64: 2>, scalar_prefetch = 0 : i64, scratch_operands = 0 : i64, tpu.core_type = #tpu.core_type<tc>, window_params = [{transform_indices = @transform_0, window_bounds = array<i64: 8, 2>}, {transform_indices = @transform_1, window_bounds = array<i64: 8, 2, 8, 32>}, {pipeline_mode = #tpu.pipeline_mode<synchronous>, transform_indices = @transform_2, window_bounds = array<i64: 64, 32>}, {pipeline_mode = #tpu.pipeline_mode<synchronous>, transform_indices = @transform_3, window_bounds = array<i64: 1, 32>}, {pipeline_mode = #tpu.pipeline_mode<synchronous>, transform_indices = @transform_4, window_bounds = array<i64: 32, 2>}, {pipeline_mode = #tpu.pipeline_mode<synchronous>, transform_indices = @transform_5, window_bounds = array<i64: 1, 2>}, {transform_indices = @transform_6, window_bounds = array<i64: 8, 128>}]} {
    %c0 = arith.constant 0 : index
    %c0_0 = arith.constant 0 : index
    %c0_1 = arith.constant 0 : index
    %c0_2 = arith.constant 0 : index
    %0 = vector.load %arg2[%c0, %c0_0, %c0_1, %c0_2] : memref<8x2x8x32xf32, #tpu.memory_space<vmem>>, vector<8x2x8x32xf32>
    %c0_3 = arith.constant 0 : index
    %c0_4 = arith.constant 0 : index
    %1 = vector.load %arg1[%c0_3, %c0_4] : memref<8x2xi32, #tpu.memory_space<vmem>>, vector<8x2xi32>
    %2 = tpu.iota {dimensions = array<i32: 1>} : vector<8x8xi32>
    %3 = vector.extract_strided_slice %1 {offsets = [0, 0], sizes = [8, 1], strides = [1, 1]} : vector<8x2xi32> to vector<8x1xi32>
    %4 = vector.broadcast %3 : vector<8x1xi32> to vector<8x8xi32>
    %5 = arith.cmpi eq, %2, %4 : vector<8x8xi32>
    %6 = arith.extui %5 : vector<8x8xi1> to vector<8x8xi32>
    %7 = arith.sitofp %6 : vector<8x8xi32> to vector<8x8xf32>
    %8 = vector.extract_strided_slice %1 {offsets = [0, 1], sizes = [8, 1], strides = [1, 1]} : vector<8x2xi32> to vector<8x1xi32>
    %9 = vector.broadcast %8 : vector<8x1xi32> to vector<8x8xi32>
    %10 = arith.cmpi eq, %2, %9 : vector<8x8xi32>
    %11 = arith.extui %10 : vector<8x8xi1> to vector<8x8xi32>
    %12 = arith.sitofp %11 : vector<8x8xi32> to vector<8x8xf32>
    %13 = vector.extract_strided_slice %0 {offsets = [0, 0, 0, 0], sizes = [8, 1, 8, 32], strides = [1, 1, 1, 1]} : vector<8x2x8x32xf32> to vector<8x1x8x32xf32>
    %14 = vector.shape_cast %13 : vector<8x1x8x32xf32> to vector<8x8x32xf32>
    %15 = vector.shape_cast %7 : vector<8x8xf32> to vector<8x8x1xf32>
    %16 = vector.broadcast %15 : vector<8x8x1xf32> to vector<8x8x32xf32>
    %17 = arith.mulf %14, %16 : vector<8x8x32xf32>
    %cst = arith.constant dense<0.000000e+00> : vector<8x32xf32>
    %18 = vector.multi_reduction <add>, %17, %cst [1] : vector<8x8x32xf32> to vector<8x32xf32>
    %19 = vector.extract_strided_slice %0 {offsets = [0, 1, 0, 0], sizes = [8, 1, 8, 32], strides = [1, 1, 1, 1]} : vector<8x2x8x32xf32> to vector<8x1x8x32xf32>
    %20 = vector.shape_cast %19 : vector<8x1x8x32xf32> to vector<8x8x32xf32>
    %21 = vector.shape_cast %12 : vector<8x8xf32> to vector<8x8x1xf32>
    %22 = vector.broadcast %21 : vector<8x8x1xf32> to vector<8x8x32xf32>
    %23 = arith.mulf %20, %22 : vector<8x8x32xf32>
    %cst_5 = arith.constant dense<0.000000e+00> : vector<8x32xf32>
    %24 = vector.multi_reduction <add>, %23, %cst_5 [1] : vector<8x8x32xf32> to vector<8x32xf32>
    %c0_6 = arith.constant 0 : index
    %c0_7 = arith.constant 0 : index
    %25 = vector.load %arg3[%c0_6, %c0_7] : memref<64x32xf32, #tpu.memory_space<vmem>>, vector<32x32xf32>
    %cst_8 = arith.constant dense<0.000000e+00> : vector<8x32xf32>
    %26 = tpu.matmul %18, %25, %cst_8 {dimension_numbers = #tpu.dot_dimension_numbers<[1], [0], [0], [1], [0, 0, 1, 1], [], []>} : vector<8x32xf32>, vector<32x32xf32>, vector<8x32xf32> -> vector<8x32xf32>
    %c32 = arith.constant 32 : index
    %c0_9 = arith.constant 0 : index
    %27 = vector.load %arg3[%c32, %c0_9] : memref<64x32xf32, #tpu.memory_space<vmem>>, vector<32x32xf32>
    %cst_10 = arith.constant dense<0.000000e+00> : vector<8x32xf32>
    %28 = tpu.matmul %24, %27, %cst_10 {dimension_numbers = #tpu.dot_dimension_numbers<[1], [0], [0], [1], [0, 0, 1, 1], [], []>} : vector<8x32xf32>, vector<32x32xf32>, vector<8x32xf32> -> vector<8x32xf32>
    %29 = arith.addf %26, %28 : vector<8x32xf32>
    %c0_11 = arith.constant 0 : index
    %c0_12 = arith.constant 0 : index
    %30 = vector.load %arg4[%c0_11, %c0_12] : memref<1x32xf32, #tpu.memory_space<vmem>>, vector<1x32xf32>
    %31 = vector.broadcast %30 : vector<1x32xf32> to vector<8x32xf32>
    %32 = arith.addf %29, %31 : vector<8x32xf32>
    %33 = math.tanh %32 : vector<8x32xf32>
    %c0_13 = arith.constant 0 : index
    %c0_14 = arith.constant 0 : index
    %34 = vector.load %arg5[%c0_13, %c0_14] : memref<32x2xf32, #tpu.memory_space<vmem>>, vector<32x2xf32>
    %cst_15 = arith.constant dense<0.000000e+00> : vector<8x2xf32>
    %35 = tpu.matmul %33, %34, %cst_15 {dimension_numbers = #tpu.dot_dimension_numbers<[1], [0], [0], [1], [0, 0, 1, 1], [], []>} : vector<8x32xf32>, vector<32x2xf32>, vector<8x2xf32> -> vector<8x2xf32>
    %c0_16 = arith.constant 0 : index
    %c0_17 = arith.constant 0 : index
    %36 = vector.load %arg6[%c0_16, %c0_17] : memref<1x2xf32, #tpu.memory_space<vmem>>, vector<1x2xf32>
    %37 = vector.broadcast %36 : vector<1x2xf32> to vector<8x2xf32>
    %38 = arith.addf %35, %37 : vector<8x2xf32>
    %cst_18 = arith.constant dense<0xFF800000> : vector<8xf32>
    %39 = vector.multi_reduction <maximumf>, %38, %cst_18 [1] : vector<8x2xf32> to vector<8xf32>
    %40 = vector.shape_cast %39 : vector<8xf32> to vector<8x1xf32>
    %41 = vector.broadcast %40 : vector<8x1xf32> to vector<8x2xf32>
    %42 = arith.subf %38, %41 : vector<8x2xf32>
    %43 = math.exp %42 : vector<8x2xf32>
    %cst_19 = arith.constant dense<0.000000e+00> : vector<8xf32>
    %44 = vector.multi_reduction <add>, %43, %cst_19 [1] : vector<8x2xf32> to vector<8xf32>
    %45 = vector.shape_cast %44 : vector<8xf32> to vector<8x1xf32>
    %46 = vector.broadcast %45 : vector<8x1xf32> to vector<8x2xf32>
    %47 = arith.divf %43, %46 : vector<8x2xf32>
    %48 = tpu.iota {dimensions = array<i32: 1>} : vector<8x128xi32>
    %cst_20 = arith.constant 0.000000e+00 : f32
    %49 = vector.broadcast %cst_20 : f32 to vector<8x128xf32>
    %c0_i32 = arith.constant 0 : i32
    %50 = vector.broadcast %c0_i32 : i32 to vector<8x128xi32>
    %51 = arith.cmpi eq, %48, %50 : vector<8x128xi32>
    %52 = vector.extract_strided_slice %38 {offsets = [0, 0], sizes = [8, 1], strides = [1, 1]} : vector<8x2xf32> to vector<8x1xf32>
    %53 = vector.shape_cast %52 : vector<8x1xf32> to vector<8x1xf32>
    %54 = vector.broadcast %53 : vector<8x1xf32> to vector<8x128xf32>
    %55 = arith.select %51, %54, %49 : vector<8x128xi1>, vector<8x128xf32>
    %c2_i32 = arith.constant 2 : i32
    %56 = vector.broadcast %c2_i32 : i32 to vector<8x128xi32>
    %57 = arith.cmpi eq, %48, %56 : vector<8x128xi32>
    %58 = vector.extract_strided_slice %47 {offsets = [0, 0], sizes = [8, 1], strides = [1, 1]} : vector<8x2xf32> to vector<8x1xf32>
    %59 = vector.shape_cast %58 : vector<8x1xf32> to vector<8x1xf32>
    %60 = vector.broadcast %59 : vector<8x1xf32> to vector<8x128xf32>
    %61 = arith.select %57, %60, %55 : vector<8x128xi1>, vector<8x128xf32>
    %c1_i32 = arith.constant 1 : i32
    %62 = vector.broadcast %c1_i32 : i32 to vector<8x128xi32>
    %63 = arith.cmpi eq, %48, %62 : vector<8x128xi32>
    %64 = vector.extract_strided_slice %38 {offsets = [0, 1], sizes = [8, 1], strides = [1, 1]} : vector<8x2xf32> to vector<8x1xf32>
    %65 = vector.shape_cast %64 : vector<8x1xf32> to vector<8x1xf32>
    %66 = vector.broadcast %65 : vector<8x1xf32> to vector<8x128xf32>
    %67 = arith.select %63, %66, %61 : vector<8x128xi1>, vector<8x128xf32>
    %c3_i32 = arith.constant 3 : i32
    %68 = vector.broadcast %c3_i32 : i32 to vector<8x128xi32>
    %69 = arith.cmpi eq, %48, %68 : vector<8x128xi32>
    %70 = vector.extract_strided_slice %47 {offsets = [0, 1], sizes = [8, 1], strides = [1, 1]} : vector<8x2xf32> to vector<8x1xf32>
    %71 = vector.shape_cast %70 : vector<8x1xf32> to vector<8x1xf32>
    %72 = vector.broadcast %71 : vector<8x1xf32> to vector<8x128xf32>
    %73 = arith.select %69, %72, %67 : vector<8x128xi1>, vector<8x128xf32>
    %c0_21 = arith.constant 0 : index
    %c0_22 = arith.constant 0 : index
    %74 = vector.load %arg7[%c0_21, %c0_22] : memref<8x128xf32, #tpu.memory_space<vmem>>, vector<8x128xf32>
    tpu.vector_store %arg7[%c0_21, %c0_22], %73 {strides = array<i32>} : memref<8x128xf32, #tpu.memory_space<vmem>>, vector<8x128xf32>,
    return
  }
  func.func @transform_0(%arg0: i32) -> (i32, i32) {
    %c0_i32 = arith.constant 0 : i32
    %c0_i32_0 = arith.constant 0 : i32
    return %arg0, %c0_i32 : i32, i32
  }
  func.func @transform_1(%arg0: i32) -> (i32, i32, i32, i32) {
    %c0_i32 = arith.constant 0 : i32
    %c0_i32_0 = arith.constant 0 : i32
    %c0_i32_1 = arith.constant 0 : i32
    %c0_i32_2 = arith.constant 0 : i32
    return %arg0, %c0_i32, %c0_i32_0, %c0_i32_1 : i32, i32, i32, i32
  }
  func.func @transform_2(%arg0: i32) -> (i32, i32) {
    %c0_i32 = arith.constant 0 : i32
    %c0_i32_0 = arith.constant 0 : i32
    %c0_i32_1 = arith.constant 0 : i32
    return %c0_i32, %c0_i32_0 : i32, i32
  }
  func.func @transform_3(%arg0: i32) -> (i32, i32) {
    %c0_i32 = arith.constant 0 : i32
    %c0_i32_0 = arith.constant 0 : i32
    %c0_i32_1 = arith.constant 0 : i32
    return %c0_i32, %c0_i32_0 : i32, i32
  }
  func.func @transform_4(%arg0: i32) -> (i32, i32) {
    %c0_i32 = arith.constant 0 : i32
    %c0_i32_0 = arith.constant 0 : i32
    %c0_i32_1 = arith.constant 0 : i32
    return %c0_i32, %c0_i32_0 : i32, i32
  }
  func.func @transform_5(%arg0: i32) -> (i32, i32) {
    %c0_i32 = arith.constant 0 : i32
    %c0_i32_0 = arith.constant 0 : i32
    %c0_i32_1 = arith.constant 0 : i32
    return %c0_i32, %c0_i32_0 : i32, i32
  }
  func.func @transform_6(%arg0: i32) -> (i32, i32) {
    %c0_i32 = arith.constant 0 : i32
    %c0_i32_0 = arith.constant 0 : i32
    return %arg0, %c0_i32 : i32, i32
  }
}

</mosaic_0001>

<bundles_post_ra>
// kernel: tpu_custom_call.1
= control target key start
LH: loop header
LB: loop body
LE: loop exit
PB: predicated region body
PF: predicated region fallthrough
CT: control target
= control target key end

     0   :  { %11 = vsyncpa [#allocation3], 0  ;;  %s1573_s0 = inlined_call_operand.vmem [shape: s32[16,2], index: 0, kind: input, shape index: {}]   ;;  %s1574_s1 = inlined_call_operand.hbm [shape: f32[16,2,8,32], index: 1, kind: input, shape index: {}]   ;;  %s1575_s2 = inlined_call_operand.vmem [shape: f32[64,32], index: 2, kind: input, shape index: {}]   ;;  %s1576_s3 = inlined_call_operand.vmem [shape: f32[1,32], index: 3, kind: input, shape index: {}]   ;;  %s1577_s4 = inlined_call_operand.vmem [shape: f32[32,2], index: 4, kind: input, shape index: {}]   ;;  %s1578_s5 = inlined_call_operand.vmem [shape: f32[1,2], index: 5, kind: input, shape index: {}]   ;;  %s1579_s6 = inlined_call_operand.hbm [shape: f32[16,128], index: 6, kind: output, shape index: {}]  }
   0x1   :  { %13 = vsyncpa [#allocation3 + $0x1], 0 }
   0x2   :  { %14 = vsyncpa [#allocation4], 0 }
   0x3   :  { %16 = vsyncpa [#allocation4 + $0x1], 0  ;;  %s1276_s21 = smov 0   ;;  %s1278_s22 = smov 0  }
   0x4   :  { %s1280_s23 = smov 0   ;;  %s1282_s24 = smov 0  }
   0x5 LB: > { %s1297_s25 = sadd.s32 4294967295, %s1230_s24   ;;  %s978_s26 = sadd.s32 4294967294, %s1230_s24   ;;  %s1230_s24 = sphi %s1282_s24, %s1592_s24   ;;  %s1226_s23 = sphi %s1280_s23, %s1591_s23   ;;  %s1222_s22 = sphi %s1278_s22, %s1590_s22   ;;  %s1218_s21 = sphi %s1276_s21, %s1589_s21  }
   0x6   : > { %s1301_s27 = sadd.s32 1, %s1230_s24   ;;  %s55_s28 = sadd.s32 1, %s1226_s23 }
   0x7   : > { %s52_s29 = ssub.s32 %s1230_s24, %s1301_s27  ;;  %p62_p0 = scmp.ne.s32.totalorder %s1226_s23, %s1222_s22 }
   0x8   : > { %p53_p1 = scmp.eq.s32.totalorder %s52_s29, 0  ;;  %p63_p2 = scmp.eq.s32.totalorder %s1230_s24, 0 }
   0x9   : > { %p68_p3 = scmp.ne.s32.totalorder %s1222_s22, %s1218_s21  ;;  %p69_p4 = scmp.eq.s32.totalorder %s1297_s25, 0 }
   0xa   : > { %s1313_s30 = scalar_select %p53_p1, %s1226_s23, %s55_s28  }
   0xb   : > { %p1315_p5 = por %p63_p2, %p62_p0  ;;  %p1319_p6 = por %p69_p4, %p68_p3 }
   0xc   : > { %p176_p7 = scmp.eq.s32.totalorder %s1297_s25, 1  ;;  %p182_p8 = scmp.eq.s32.totalorder %s978_s26, 1 }
   0xd   : > { %p1080_p10 = scmp.lt.s32.totalorder %s1230_s24, 2  ;;  %s221_s11 = sand.u32 1, %s1226_s23  }
   0xe   : > { %p1326_p11 = por %p176_p7, %p62_p0  ;;  %p1330_p12 = por %p182_p8, %p68_p3 }
   0xf   : > { %s1001_s12 = sshll.u32 %s1230_s24, 11  ;;  %s981_s13 = sshll.u32 %s221_s11, 7 }
  0x10   : > { %s1583_s9 = scalar_select %p1326_p11, 1, 0 }
  0x11   : > { %s1584_s10 = scalar_select %p1330_p12, 1, 0 }
  0x12   : > { %s1339_s16 = scalar_lea.hbm %s1574_s1, %s1001_s12  ;;  %s225_s17 = scalar_lea.vmem [#allocation2], %s981_s13 }
  0x13   : > { %s233_s18 = sshll.u32 %s225_s17, 4  ;;  %p1343_p13 = pnand %p1080_p10, %p1315_p5  ;;  %s1347_s18 = int_to_ptr.vmem [resolvable:$true] %s233_s18 }
  0x14   : > { %s1349_s20 = scalar_lea.sflag [#allocation3], %s221_s11  ;;  %s1134_s26 = scalar_lea.hbm %s1339_s16, 2048 }
  0x15   : > { %p1135_p0 = scmp.ne.s32.totalorder %s1339_s16, %s1134_s26  ;;  %p1136_p1 = pneg %p1343_p13 }
  0x16   : > { %s1139_s7 = scalar_lea.hbm %s1574_s1, 4096  ;;  %p1140_p4 = scmp.lt.u32.totalorder %s1339_s16, %s1574_s1 }
  0x17   : > { %p1137_p2 = pnand %p1136_p1, %p1135_p0  ;;  %p1141_p5 = scmp.lt.u32.totalorder %s1139_s7, %s1134_s26 }
  0x18   : > { %p1143_p8 = scmp.lt.u32.totalorder %s1134_s26, %s1339_s16 }
  0x19   : > { %p1138_p3 = pneg %p1137_p2  ;;  %p1142_p7 = por %p1141_p5, %p1140_p4 }
  0x1b   : > { %p1144_p10 = por %p1143_p8, %p1142_p7 }
  0x1d   : > { %p1145_p9 = pnand %p1144_p10, %p1138_p3 }
  0x1f   : > { %1148 = shalt.err (!%p1145_p9)
}
  0x20   : > { %s1149_s11 = scalar_lea.vmem %s1347_s18, 2048  ;;  %s1232_s14 = smov [#allocation2]  }
  0x21   : > { %p1150_p0 = scmp.ne.s32.totalorder %s1347_s18, %s1149_s11  ;;  %s1154_s15 = sshll.u32 %s1232_s14, 4  ;;  %s1155_s15 = int_to_ptr.vmem [resolvable:$false] %s1154_s15 }
  0x22   : > { %s1156_s17 = scalar_lea.vmem %s1155_s15, 4096  ;;  %p1157_p11 = scmp.lt.s32.totalorder %s1347_s18, %s1155_s15 }
  0x23   : > { %p1152_p2 = pnand %p1150_p0, %p1136_p1  ;;  %p1158_p4 = scmp.lt.s32.totalorder %s1156_s17, %s1149_s11 }
  0x25   : > { %p1153_p12 = pneg %p1152_p2  ;;  %p1159_p5 = por %p1158_p4, %p1157_p11 }
  0x27   : > { %p1160_p7 = pnand %p1159_p5, %p1153_p12 }
  0x29   : > { %1163 = shalt.err (!%p1160_p7)
}
  0x2a   : > { %s1233_s26 = smov 128   ;;  %s1234_s28 = smov 8  }
  0x2b   : > { %1075 = dma.hbm_to_vmem [thread:$0]  (!%p1343_p13), %s1339_s16, 2048, %s1347_s18, %s1349_s20, %s1233_s26, %s1233_s26, %s1234_s28  }
  0x2c   : > { %p985_p9 = scmp.ge.s32.totalorder %s1230_s24, 1  ;;  %p241_p1 = scmp.lt.s32.totalorder %s1230_s24, 3 }
  0x2e   : > { %p242_p3 = pnand %p985_p9, %p241_p1 }
  0x2f   : > { %s1380_s29 = sand.u32 (!%p242_p3), 1, %s1222_s22  }
  0x30   : > { %245 = sbr.rel (%p242_p3) target bundleno = 1261 (0x4ed), region = 44  ;;  %s986_s7 = sshll.u32 (!%p242_p3), %s1380_s29, 7 }
  0x31   : > { %s248_s12 = scalar_lea.sflag (!%p242_p3), [#allocation3], %s1380_s29  ;;  %s1384_s13 = scalar_lea.vmem (!%p242_p3), [#allocation2], %s986_s7 }
  0x37   : > { %1209 = dma.done.wait (%p1319_p6), %s248_s12, 2048  }
  0x38   : > { %1211 = vsyncadd (%p1319_p6), %s248_s12, 4294965248  ;;  %p284_p11 = scmp.lt.s32.totalorder %s1297_s25, 1  ;;  %v1235_v0 = vmov 0   ;;  %v1236_v1 = vmov 1   ;;  %v306_v3 = vlaneseq  ;;  %v1237_v8 = vmov 0.0   ;;  %v565_v31 = vld [vmem:[%s1575_s2 + $0x20] sm:$0xff] }
  0x39   : > { %1121 = vset.pattern.permute.xlu0 %v1235_v0  ;;  %1124 = vset.pattern.permute.xlu1 %v1236_v1  ;;  %v566_v32 = vld [vmem:[%s1575_s2 + $0x28] sm:$0xff]  ;;  %v1238_v36 = vmov 0.0|0.0   ;;  %v561_v38 = vld [vmem:[%s1575_s2] sm:$0xff]  ;;  %v567_v41 = vld [vmem:[%s1575_s2 + $0x30] sm:$0xff]  ;;  %vm1239_vm2 = vmmov 0   ;;  %vm384_vm3 = vcmask 261120  }
  0x3a   : > { %s285_s16 = scalar_select %p284_p11, %s1297_s25, 1  ;;  %v321_v4 = vshrl.u32 %v306_v3, 7  ;;  %v1399_v5 = vand.u32 127, %v306_v3  ;;  %v1051_v34 = vpack.c.bf16 %v566_v32, %v565_v31  ;;  %1050 = vmatprep.subr.bf16.mxu0 %v1238_v36  ;;  %1056 = vmatprep.subr.bf16.mxu1 %v1238_v36  ;;  %v562_v39 = vld [vmem:[%s1575_s2 + $0x8] sm:$0xff]  ;;  %v568_v42 = vld [vmem:[%s1575_s2 + $0x38] sm:$0xff]  ;;  %v563_v45 = vld [vmem:[%s1575_s2 + $0x10] sm:$0xff] }
  0x3b   : > { %v1057_v40 = vpack.c.bf16 %v562_v39, %v561_v38  ;;  %v1054_v43 = vpack.c.bf16 %v568_v42, %v567_v41  ;;  %v564_v46 = vld [vmem:[%s1575_s2 + $0x18] sm:$0xff]  ;;  %1025 = vmatprep.mubr.msk.f32.mxu0 %vm1239_vm2, %v1237_v8  ;;  %1036 = vmatprep.mubr.msk.f32.mxu1 %vm1239_vm2, %v1237_v8  ;;  %v289_v49 = vld [vmem:[%s1384_s13] sm:$0xff]  ;;  %v291_v50 = vld [vmem:[%s1384_s13 + $0x10] sm:$0xff]  ;;  %vm577_vm4 = vcmask 1041409   ;;  %vm579_vm5 = vcmask 1042434   ;;  %s987_s14 = sshll.u32 %s1380_s29, 3 }
  0x3c   : > { %s988_s18 = sshll.u32 %s285_s16, 3  ;;  %v322_v6 = vsub.s32 0, %v321_v4  ;;  %v329_v11 = vsub.s32 1, %v321_v4  ;;  %v336_v16 = vsub.s32 2, %v321_v4  ;;  %v343_v19 = vsub.s32 3, %v321_v4  ;;  %1052 = vmatpush3.bf16.msra.mxu0 %v1051_v34  ;;  %v292_v52 = vld [vmem:[%s1384_s13 + $0x18] sm:$0xff] }
  0x3d   : > { %s287_s11 = scalar_lea.vmem %s1573_s0, %s988_s18  ;;  %v350_v22 = vsub.s32 4, %v321_v4  ;;  %v357_v25 = vsub.s32 5, %v321_v4  ;;  %v364_v28 = vsub.s32 6, %v321_v4  ;;  %v371_v33 = vsub.s32 7, %v321_v4  ;;  %1053 = vmatprep.subr.bf16.mxu0 %v1238_v36  ;;  %1058 = vmatpush3.bf16.msra.mxu1 %v1057_v40  ;;  %v290_v57 = vld [vmem:[%s1384_s13 + $0x8] sm:$0xff]  ;;  %v297_v40 = vld [vmem:[%s1384_s13 + $0x40] sm:$0xff] }
  0x3e   : > { %v305_v2 = vld [vmem:[%s287_s11] sm:$0xff]  ;;  %1059 = vmatprep.subr.bf16.mxu1 %v1238_v36  ;;  %v1060_v47 = vpack.c.bf16 %v564_v46, %v563_v45  ;;  %v294_v60 = vld [vmem:[%s1384_s13 + $0x28] sm:$0xff]  ;;  %vm581_vm6 = vcmask 1043459   ;;  %vm583_vm7 = vcmask 1044484   ;;  %vm585_vm8 = vcmask 1045509   ;;  %s997_s15 = sshll.u32 %s1297_s25, 7 }
  0x3f   : > { %309 = vperm.xlu0 %1121, %v305_v2   ;;  %vm587_vm9 = vcmask 1046534   ;;  %vm589_vm10 = vcmask 1047559   ;;  %vm843_vm11 = vcmask 15360   ;;  %vm855_vm12 = vcmp.eq.s32.totalorder %v1399_v5, 0  ;;  %s1529_s7 = scalar_lea.hbm %s1579_s6, %s997_s15  ;;  %s883_s12 = scalar_lea.sflag [#allocation4], %s1380_s29 }
  0x40   : > { %1055 = vmatpush3.bf16.msra.mxu0 %v1054_v43  ;;  %vm862_vm13 = vcmp.eq.s32.totalorder %v1399_v5, 2  ;;  %vm869_vm14 = vcmp.eq.s32.totalorder %v1399_v5, 1  ;;  %vm875_vm15 = vcmp.eq.s32.totalorder %v1399_v5, 3  ;;  %p1586_p12 = scmp.ne.s32.totalorder %s1583_s9, 0  ;;  %s1240_s16 = smov [#allocation5]  }
  0x41   : > { %1062 = vmatprep.subr.bf16.mxu0 %v1238_v36  ;;  %1061 = vmatpush3.bf16.msra.mxu1 %v1060_v47  ;;  %v300_v47 = vld [vmem:[%s1384_s13 + $0x58] sm:$0xff]  ;;  %s1168_s18 = sshll.u32 %s1240_s16, 4  ;;  %s1169_s18 = int_to_ptr.vmem [resolvable:$false] %s1168_s18 }
  0x42   : > { %s1170_s19 = scalar_lea.vmem %s1169_s18, 256 }
  0x43   : > { %1122 = vset.pattern.permute.xlu0 %v1236_v1 }
  0x44   : > { %315 = vperm.xlu0 %1122, %v305_v2  }
  0x48   : > { %1123 = vset.pattern.permute.xlu0 %v1235_v0 }
  0xbe   : > { %v310_v7 = vpop.permute.xlu0 %309 }
  0xbf   : > { %vm311_vm0 = vcmp.eq.s32.totalorder %v1399_v5, %v310_v7 }
  0xc0   : > { %v989_v9 = vsel %vm311_vm0, 1.0, %v1237_v8 }
  0xc1   : > { %v323_v10 = vrot.slane %v989_v9, %v322_v6  ;;  %v330_v14 = vrot.slane %v989_v9, %v329_v11  ;;  %v337_v20 = vrot.slane %v989_v9, %v336_v16  ;;  %v344_v23 = vrot.slane %v989_v9, %v343_v19 }
  0xc2   : > { %v351_v26 = vrot.slane %v989_v9, %v350_v22  ;;  %v358_v29 = vrot.slane %v989_v9, %v357_v25  ;;  %v365_v35 = vrot.slane %v989_v9, %v364_v28  ;;  %v372_v44 = vrot.slane %v989_v9, %v371_v33  ;;  %v293_v9 = vld [vmem:[%s1384_s13 + $0x20] sm:$0xff] }
  0xc3   : > { %325 = vbcast.lane.b32.xlu1 %v323_v10, 256  ;;  %v316_v12 = vpop.permute.xlu0 %315 }
  0xc4   : > { %vm317_vm1 = vcmp.eq.s32.totalorder %v1399_v5, %v316_v12  ;;  %v296_v12 = vld [vmem:[%s1384_s13 + $0x38] sm:$0xff] }
  0xc5   : > { %v990_v13 = vsel %vm317_vm1, 1.0, %v1237_v8 }
  0xc6   : > { %v451_v15 = vrot.slane %v990_v13, %v329_v11  ;;  %v444_v17 = vrot.slane %v990_v13, %v322_v6  ;;  %v458_v18 = vrot.slane %v990_v13, %v336_v16  ;;  %v465_v21 = vrot.slane %v990_v13, %v343_v19 }
  0xc7   : > { %332 = vbcast.lane.b32.xlu1 %v330_v14, 256  ;;  %v472_v24 = vrot.slane %v990_v13, %v350_v22  ;;  %v479_v27 = vrot.slane %v990_v13, %v357_v25  ;;  %v486_v30 = vrot.slane %v990_v13, %v364_v28  ;;  %v493_v37 = vrot.slane %v990_v13, %v371_v33 }
  0xc8   : > { %453 = vbcast.lane.b32.xlu0 %v451_v15, 256 }
  0xcb   : > { %446 = vbcast.lane.b32.xlu1 %v444_v17, 256 }
  0xcc   : > { %460 = vbcast.lane.b32.xlu0 %v458_v18, 256 }
  0xcf   : > { %339 = vbcast.lane.b32.xlu1 %v337_v20, 256 }
  0xd0   : > { %467 = vbcast.lane.b32.xlu0 %v465_v21, 256 }
  0xd3   : > { %346 = vbcast.lane.b32.xlu1 %v344_v23, 256  ;;  %v295_v23 = vld [vmem:[%s1384_s13 + $0x30] sm:$0xff] }
  0xd4   : > { %474 = vbcast.lane.b32.xlu0 %v472_v24, 256 }
  0xd7   : > { %353 = vbcast.lane.b32.xlu1 %v351_v26, 256 }
  0xd8   : > { %481 = vbcast.lane.b32.xlu0 %v479_v27, 256  ;;  %v298_v27 = vld [vmem:[%s1384_s13 + $0x48] sm:$0xff] }
  0xdb   : > { %360 = vbcast.lane.b32.xlu1 %v358_v29, 256 }
  0xdc   : > { %488 = vbcast.lane.b32.xlu0 %v486_v30, 256 }
  0xdf   : > { %367 = vbcast.lane.b32.xlu1 %v365_v35, 256 }
  0xe0   : > { %495 = vbcast.lane.b32.xlu0 %v493_v37, 256 }
  0xe3   : > { %374 = vbcast.lane.b32.xlu1 %v372_v44, 256 }
 0x135   : > { %v326_v48 = vpop.permute.xlu1 %325 }
 0x136   : > { %v376_v51 = vmul.f32 %v326_v48, %v289_v49 }
 0x138   : > { %v385_v58 = vsel %vm384_vm3, %v376_v51, 0.0 }
 0x139   : > { %v333_v53 = vpop.permute.xlu1 %332  ;;  %v386_v6 = vrot.slane %v385_v58, 4 }
 0x13a   : > { %v377_v54 = vmul.f32 %v333_v53, %v291_v50  ;;  %v454_v55 = vpop.permute.xlu0 %453 }
 0x13b   : > { %v498_v56 = vmul.f32 %v454_v55, %v292_v52  ;;  %v387_v20 = vadd.f32 %v386_v6, %v385_v58 }
 0x13c   : > { %v392_v59 = vsel %vm384_vm3, %v377_v54, 0.0 }
 0x13d   : > { %v393_v61 = vrot.slane %v392_v59, 4  ;;  %v512_v62 = vsel %vm384_vm3, %v498_v56, 0.0  ;;  %v447_v63 = vpop.permute.xlu1 %446  ;;  %v388_v37 = vrot.slane %v387_v20, 2 }
 0x13e   : > { %v513_v2 = vrot.slane %v512_v62, 4  ;;  %v497_v3 = vmul.f32 %v447_v63, %v290_v57  ;;  %v461_v4 = vpop.permute.xlu0 %460 }
 0x13f   : > { %v499_v7 = vmul.f32 %v461_v4, %v294_v60  ;;  %v394_v10 = vadd.f32 %v393_v61, %v392_v59  ;;  %v1458_v53 = vadd.f32 %v388_v37, %v387_v20 }
 0x140   : > { %v505_v11 = vsel %vm384_vm3, %v497_v3, 0.0  ;;  %v514_v13 = vadd.f32 %v513_v2, %v512_v62  ;;  %v299_v2 = vld [vmem:[%s1384_s13 + $0x50] sm:$0xff]  ;;  %v302_v3 = vld [vmem:[%s1384_s13 + $0x68] sm:$0xff] }
 0x141   : > { %v506_v14 = vrot.slane %v505_v11, 4  ;;  %v519_v15 = vsel %vm384_vm3, %v499_v7, 0.0  ;;  %v340_v16 = vpop.permute.xlu1 %339  ;;  %v395_v24 = vrot.slane %v394_v10, 2 }
 0x142   : > { %v520_v17 = vrot.slane %v519_v15, 4  ;;  %v378_v18 = vmul.f32 %v340_v16, %v293_v9  ;;  %v468_v19 = vpop.permute.xlu0 %467  ;;  %v515_v28 = vrot.slane %v514_v13, 2 }
 0x143   : > { %v507_v21 = vadd.f32 %v506_v14, %v505_v11  ;;  %v500_v22 = vmul.f32 %v468_v19, %v296_v12  ;;  %v396_v41 = vadd.f32 %v395_v24, %v394_v10  ;;  %v390_v11 = vrot.slane %v1458_v53, 1  ;;  %v301_v24 = vld [vmem:[%s1384_s13 + $0x60] sm:$0xff] }
 0x144   : > { %v521_v25 = vadd.f32 %v520_v17, %v519_v15  ;;  %v399_v26 = vsel %vm384_vm3, %v378_v18, 0.0  ;;  %v516_v43 = vadd.f32 %v515_v28, %v514_v13 }
 0x145   : > { %v508_v29 = vrot.slane %v507_v21, 2  ;;  %v526_v30 = vsel %vm384_vm3, %v500_v22, 0.0  ;;  %v347_v31 = vpop.permute.xlu1 %346  ;;  %v400_v32 = vrot.slane %v399_v26, 4  ;;  %v397_v56 = vrot.slane %v396_v41, 1 }
 0x146   : > { %v527_v33 = vrot.slane %v526_v30, 4  ;;  %v379_v34 = vmul.f32 %v347_v31, %v295_v23  ;;  %v475_v35 = vpop.permute.xlu0 %474  ;;  %v522_v38 = vrot.slane %v521_v25, 2  ;;  %v517_v59 = vrot.slane %v516_v43, 1 }
 0x147   : > { %v501_v39 = vmul.f32 %v475_v35, %v298_v27  ;;  %v509_v44 = vadd.f32 %v508_v29, %v507_v21  ;;  %v401_v48 = vadd.f32 %v400_v32, %v399_v26  ;;  %v1465_v15 = vadd.f32 %v397_v56, %v396_v41 }
 0x148   : > { %v406_v42 = vsel %vm384_vm3, %v379_v34, 0.0  ;;  %v528_v45 = vadd.f32 %v527_v33, %v526_v30  ;;  %v523_v54 = vadd.f32 %v522_v38, %v521_v25  ;;  %v518_v19 = vadd.f32 %v517_v59, %v516_v43  ;;  %v304_v25 = vld [vmem:[%s1384_s13 + $0x78] sm:$0xff] }
 0x149   : > { %v354_v46 = vpop.permute.xlu1 %353  ;;  %v407_v49 = vrot.slane %v406_v42, 4  ;;  %v533_v50 = vsel %vm384_vm3, %v501_v39, 0.0  ;;  %v510_v60 = vrot.slane %v509_v44, 1  ;;  %v402_v4 = vrot.slane %v401_v48, 2 }
 0x14a   : > { %v380_v51 = vmul.f32 %v354_v46, %v297_v40  ;;  %v482_v52 = vpop.permute.xlu0 %481  ;;  %v534_v55 = vrot.slane %v533_v50, 4  ;;  %v529_v61 = vrot.slane %v528_v45, 2  ;;  %v524_v12 = vrot.slane %v523_v54, 1 }
 0x14b   : > { %v502_v58 = vmul.f32 %v482_v52, %v300_v47  ;;  %v408_v6 = vadd.f32 %v407_v49, %v406_v42  ;;  %v511_v20 = vadd.f32 %v510_v60, %v509_v44  ;;  %v403_v26 = vadd.f32 %v402_v4, %v401_v48 }
 0x14c   : > { %v413_v57 = vsel %vm384_vm3, %v380_v51, 0.0  ;;  %v535_v62 = vadd.f32 %v534_v55, %v533_v50  ;;  %v530_v21 = vadd.f32 %v529_v61, %v528_v45  ;;  %v525_v31 = vadd.f32 %v524_v12, %v523_v54  ;;  %v303_v45 = vld [vmem:[%s1384_s13 + $0x70] sm:$0xff]  ;;  %s283_s13 = scalar_lea.vmem [#allocation5], %s987_s14 }
 0x14d   : > { %v361_v63 = vpop.permute.xlu1 %360  ;;  %v414_v7 = vrot.slane %v413_v57, 4  ;;  %v540_v9 = vsel %vm384_vm3, %v502_v58, 0.0  ;;  %v409_v27 = vrot.slane %v408_v6, 2  ;;  %v578_v40 = vsel %vm577_vm4, %v518_v19, %v511_v20  ;;  %s896_s17 = sshll.u32 %s283_s13, 4  ;;  %s1531_s17 = int_to_ptr.vmem [resolvable:$true] %s896_s17 }
 0x14e   : > { %v489_v10 = vpop.permute.xlu0 %488  ;;  %v536_v13 = vrot.slane %v535_v62, 2  ;;  %v541_v14 = vrot.slane %v540_v9, 4  ;;  %v381_v17 = vmul.f32 %v361_v63, %v299_v2  ;;  %v531_v41 = vrot.slane %v530_v21, 1  ;;  %s1164_s25 = scalar_lea.vmem %s1531_s17, 128  ;;  %p1171_p10 = scmp.lt.s32.totalorder %s1531_s17, %s1169_s18 }
 0x14f   : > { %v415_v16 = vadd.f32 %v414_v7, %v413_v57  ;;  %v503_v18 = vmul.f32 %v489_v10, %v302_v3  ;;  %v410_v46 = vadd.f32 %v409_v27, %v408_v6  ;;  %v404_v59 = vrot.slane %v403_v26, 1  ;;  %p1165_p6 = scmp.ne.s32.totalorder %s1531_s17, %s1164_s25  ;;  %p1172_p0 = scmp.lt.s32.totalorder %s1170_s19, %s1164_s25 }
 0x150   : > { %v542_v22 = vadd.f32 %v541_v14, %v540_v9  ;;  %v420_v28 = vsel %vm384_vm3, %v381_v17, 0.0  ;;  %v537_v32 = vadd.f32 %v536_v13, %v535_v62  ;;  %v580_v63 = vsel %vm579_vm5, %v525_v31, %v578_v40 }
 0x151   : > { %v368_v23 = vpop.permute.xlu1 %367  ;;  %v547_v29 = vsel %vm384_vm3, %v503_v18, 0.0  ;;  %v421_v34 = vrot.slane %v420_v28, 4  ;;  %v416_v35 = vrot.slane %v415_v16, 2  ;;  %v532_v2 = vadd.f32 %v531_v41, %v530_v21  ;;  %p1166_p13 = pnand %p1165_p6, %p1586_p12  ;;  %p1173_p2 = por %p1172_p0, %p1171_p10 }
 0x152   : > { %v496_v30 = vpop.permute.xlu0 %495  ;;  %v543_v33 = vrot.slane %v542_v22, 2  ;;  %v548_v37 = vrot.slane %v547_v29, 4  ;;  %v382_v38 = vmul.f32 %v368_v23, %v301_v24  ;;  %v538_v50 = vrot.slane %v537_v32, 1 }
 0x153   : > { %v504_v39 = vmul.f32 %v496_v30, %v304_v25  ;;  %v422_v43 = vadd.f32 %v421_v34, %v420_v28  ;;  %v417_v55 = vadd.f32 %v416_v35, %v415_v16  ;;  %v411_v6 = vrot.slane %v410_v46, 1  ;;  %p1167_p8 = pneg %p1166_p13 }
 0x154   : > { %v544_v42 = vadd.f32 %v543_v33, %v542_v22  ;;  %v549_v47 = vadd.f32 %v548_v37, %v547_v29  ;;  %v427_v48 = vsel %vm384_vm3, %v382_v38, 0.0  ;;  %v539_v12 = vadd.f32 %v538_v50, %v537_v32 }
 0x155   : > { %v375_v44 = vpop.permute.xlu1 %374  ;;  %v554_v49 = vsel %vm384_vm3, %v504_v39, 0.0  ;;  %v423_v51 = vrot.slane %v422_v43, 2  ;;  %v428_v52 = vrot.slane %v427_v48, 4  ;;  %v418_v13 = vrot.slane %v417_v55, 1  ;;  %p1174_p4 = pnand %p1173_p2, %p1167_p8 }
 0x156   : > { %v555_v54 = vrot.slane %v554_v49, 4  ;;  %v545_v56 = vrot.slane %v544_v42, 1  ;;  %v550_v57 = vrot.slane %v549_v47, 2  ;;  %v383_v58 = vmul.f32 %v375_v44, %v303_v45  ;;  %v759_v45 = vld [vmem:[%s1577_s4] sm:$0xff] }
 0x157   : > { %v424_v60 = vadd.f32 %v423_v51, %v422_v43  ;;  %v429_v61 = vadd.f32 %v428_v52, %v427_v48  ;;  %v391_v22 = vadd.f32 %v390_v11, %v1458_v53  ;;  %v405_v21 = vadd.f32 %v404_v59, %v403_v26  ;;  %v994_v59 = vld [vmem:[%s1578_s5] ss:$0 sm:$0xff] }
 0x158   : > { %v556_v62 = vadd.f32 %v555_v54, %v554_v49  ;;  %v551_v3 = vadd.f32 %v550_v57, %v549_v47  ;;  %v434_v4 = vsel %vm384_vm3, %v383_v58, 0.0  ;;  %v546_v14 = vadd.f32 %v545_v56, %v544_v42  ;;  %v761_v47 = vld [vmem:[%s1577_s4 + $0x10] sm:$0xff]  ;;  %v993_v54 = vld [vmem:[%s1576_s3] ss:$0 sm:$0xff] }
 0x159   : > { %v430_v7 = vrot.slane %v429_v61, 2  ;;  %v435_v10 = vrot.slane %v434_v4, 4  ;;  %v425_v17 = vrot.slane %v424_v60, 1  ;;  %v582_v23 = vsel %vm581_vm6, %v532_v2, %v580_v63 }
 0x15a   : > { %v557_v9 = vrot.slane %v556_v62, 2  ;;  %v552_v16 = vrot.slane %v551_v3, 1  ;;  %v412_v25 = vadd.f32 %v411_v6, %v410_v46  ;;  %v671_v30 = vsel %vm577_vm4, %v1465_v15, %v391_v22  ;;  %v760_v46 = vld [vmem:[%s1577_s4 + $0x8] sm:$0xff] }
 0x15b   : > { %v431_v18 = vadd.f32 %v430_v7, %v429_v61  ;;  %v436_v20 = vadd.f32 %v435_v10, %v434_v4  ;;  %v419_v31 = vadd.f32 %v418_v13, %v417_v55  ;;  %v584_v32 = vsel %vm583_vm7, %v539_v12, %v582_v23 }
 0x15c   : > { %v558_v19 = vadd.f32 %v557_v9, %v556_v62  ;;  %v553_v24 = vadd.f32 %v552_v16, %v551_v3  ;;  %v426_v33 = vadd.f32 %v425_v17, %v424_v60  ;;  %v586_v53 = vsel %vm585_vm8, %v546_v14, %v584_v32 }
 0x15d   : > { %v432_v27 = vrot.slane %v431_v18, 1  ;;  %v437_v29 = vrot.slane %v436_v20, 2  ;;  %v672_v11 = vsel %vm579_vm5, %v405_v21, %v671_v30  ;;  %v1063_v48 = vpack.c.bf16 %v760_v46, %v759_v45 }
 0x15e   : > { %v559_v28 = vrot.slane %v558_v19, 1  ;;  %v588_v37 = vsel %vm587_vm9, %v553_v24, %v586_v53  ;;  %v673_v38 = vsel %vm581_vm6, %v412_v25, %v672_v11 }
 0x15f   : > { %v438_v35 = vadd.f32 %v437_v29, %v436_v20  ;;  %v433_v26 = vadd.f32 %v432_v27, %v431_v18  ;;  %v674_v15 = vsel %vm583_vm7, %v419_v31, %v673_v38 }
 0x160   : > { %v560_v34 = vadd.f32 %v559_v28, %v558_v19  ;;  %v675_v42 = vsel %vm585_vm8, %v426_v33, %v674_v15 }
 0x161   : > { %v439_v39 = vrot.slane %v438_v35, 1  ;;  %v676_v43 = vsel %vm587_vm9, %v433_v26, %v675_v42 }
 0x162   : > { %v590_v40 = vsel %vm589_vm10, %v560_v34, %v588_v37 }
 0x163   : > { %1026 = vmatmul.mubr.msk.f32.vlgmr.msra.gmra.mrb[0].mxu0 %vm384_vm3, %v590_v40  ;;  %v440_v41 = vadd.f32 %v439_v39, %v438_v35 }
 0x164   : > { %1047 = vmatprep.mubr.msk.f32.mxu0 %vm1239_vm2, %v1237_v8  ;;  %v762_v8 = vld [vmem:[%s1577_s4 + $0x18] sm:$0xff]  ;;  %1064 = vmatpush3.bf16.msra.mxu0 %v1063_v48 }
 0x165   : > { %v677_v44 = vsel %vm589_vm10, %v440_v41, %v676_v43  ;;  %v1066_v49 = vpack.c.bf16 %v762_v8, %v761_v47  ;;  %1065 = vmatprep.subr.bf16.mxu0 %v1238_v36 }
 0x166   : > { %1037 = vmatmul.mubr.msk.f32.vlgmr.msra.gmra.mrb[0].mxu1 %vm384_vm3, %v677_v44 }
 0x168   : > { %1067 = vmatpush3.bf16.msra.mxu0 %v1066_v49 }
 0x236   : > { %v659_v50 = vpop.f32.mrb[0].mxu0 }
 0x237   : > { %v1027_v51 = vpop.f32.mrb[1].mxu0 }
 0x239   : > { %v746_v52 = vpop.f32.mrb[0].mxu1 }
 0x23a   : > { %v747_v55 = vadd.f32 %v746_v52, %v659_v50  ;;  %v1038_v56 = vpop.f32.mrb[1].mxu1 }
 0x23c   : > { %v757_v57 = vadd.f32 %v993_v54, %v747_v55 }
 0x23e   : > { %1128 = vtanh.f32 %v757_v57 }
 0x248   : > { %v1129_v58 = vpop.eup %1128 }
 0x249   : > { %1048 = vmatmul.mubr.msk.f32.vlgmr.msra.gmra.mrb[2].mxu0 %vm384_vm3, %v1129_v58 }
 0x31c   : > { %v839_v36 = vpop.f32.mrb[2].mxu0 }
 0x31d   : > { %v840_v60 = vadd.f32 %v994_v59, %v839_v36  ;;  %v1049_v61 = vpop.f32.mrb[3].mxu0 }
 0x31f   : > { %v844_v62 = vsel %vm843_vm11, %v840_v60, -inf }
 0x320   : > { %845 = vmax.xlane.f32.xlu1 %v844_v62 }
 0x331   : > { %871 = vperm.xlu1 %1124, %v840_v60  }
 0x335   : > { %1125 = vset.pattern.permute.xlu1 %v1235_v0 }
 0x3ad   : > { %v846_v63 = vpop.xlane.xlu1 %845 }
 0x3ae   : > { %v847_v2 = vsub.f32 %v840_v60, %v846_v63 }
 0x3b0   : > { %v848_v3 = vmul.f32 1.442695, %v847_v2 }
 0x3b1   : > { %v872_v0 = vpop.permute.xlu1 %871 }
 0x3b2   : > { %1130 = vpow2.f32 %v848_v3 }
 0x3bc   : > { %v1131_v4 = vpop.eup %1130 }
 0x3bd   : > { %v850_v6 = vsel %vm843_vm11, %v1131_v4, 0.0 }
 0x3be   : > { %851 = vadd.xlane.f32.xlu0 %v850_v6 }
 0x3d4   : > { %858 = vperm.xlu0 %1123, %v840_v60  }
 0x3d8   : > { %1127 = vset.pattern.permute.xlu0 %v1236_v1 }
 0x44b   : > { %v852_v7 = vpop.xlane.xlu0 %851 }
 0x44c   : > { %1132 = vrcp.f32 %v852_v7 }
 0x453   : > { %v859_v12 = vpop.permute.xlu0 %858 }
 0x454   : > { %v861_v14 = vsel %vm855_vm12, %v859_v12, 0.0 }
 0x456   : > { %v1133_v9 = vpop.eup %1132 }
 0x457   : > { %v854_v10 = vmul.f32 %v1133_v9, %v1131_v4 }
 0x459   : > { %865 = vperm.xlu1 %1125, %v854_v10  }
 0x45d   : > { %1126 = vset.pattern.permute.xlu1 %v1236_v1 }
 0x45e   : > { %877 = vperm.xlu1 %1126, %v854_v10  }
 0x4d8   : > { %v866_v13 = vpop.permute.xlu1 %865 }
 0x4d9   : > { %v868_v16 = vsel %vm862_vm13, %v866_v13, %v861_v14 }
 0x4da   : > { %v874_v1 = vsel %vm869_vm14, %v872_v0, %v868_v16 }
 0x4dd   : > { %v878_v17 = vpop.permute.xlu1 %877 }
 0x4de   : > { %v880_v18 = vsel %vm875_vm15, %v878_v17, %v874_v1 }
 0x4df   : > { %881 = vst [vmem:[%s283_s13] sm:$0xff] %v880_v18 }
 0x4e0   : > { %1177 = shalt.err (!%p1174_p4)
}
 0x4e1   : > { %s1178_s29 = scalar_lea.hbm %s1529_s7, 128  ;;  %s1182_s8 = scalar_lea.hbm %s1579_s6, 256 }
 0x4e2   : > { %p1179_p5 = scmp.ne.s32.totalorder %s1529_s7, %s1178_s29  ;;  %p1183_p1 = scmp.lt.u32.totalorder %s1529_s7, %s1579_s6 }
 0x4e3   : > { %p1184_p3 = scmp.lt.u32.totalorder %s1182_s8, %s1178_s29  ;;  %p1186_p6 = scmp.lt.u32.totalorder %s1178_s29, %s1529_s7 }
 0x4e4   : > { %p1180_p7 = pnand %p1179_p5, %p1586_p12 }
 0x4e5   : > { %p1185_p11 = por %p1184_p3, %p1183_p1 }
 0x4e6   : > { %p1181_p9 = pneg %p1180_p7 }
 0x4e7   : > { %p1187_p13 = por %p1186_p6, %p1185_p11 }
 0x4e9   : > { %p1188_p8 = pnand %p1187_p13, %p1181_p9 }
 0x4eb   : > { %1191 = shalt.err (!%p1188_p8)
}
 0x4ec   : > { %1070 = dma.vmem_to_hbm [thread:$0]  (%p1586_p12), %s1531_s17, 128, %s1529_s7, %s883_s12  }
 0x4ed PF: > { %s908_s13 = sand.u32 1, %s1218_s21   ;;  %p1587_p10 = scmp.ne.s32.totalorder %s1584_s10, 0 }
 0x4ee   : > { %p1588_p0 = scmp.ge.s32.totalorder %s1230_s24, 2  ;;  %s909_s26 = scalar_lea.sflag [#allocation4], %s908_s13 }
 0x4f0   : > { %p1077_p2 = pnand %p1588_p0, %p1587_p10 }
 0x4f2   : > { %1213 = dma.done.wait (!%p1077_p2), %s909_s26, 128  }
 0x4f3   : > { %1215 = vsyncadd (!%p1077_p2), %s909_s26, 4294967168  ;;  %p19_p4 = scmp.ge.s32.totalorder %s1301_s27, 4   ;;  %s1589_s21 = smov %s1222_s22 }
 0x4f4   : > { %s1590_s22 = smov %s1226_s23  ;;  %s1591_s23 = smov %s1313_s30 }
 0x4f5   : > { %s1592_s24 = smov %s1301_s27  ;;  %21 = sbr.rel (!%p19_p4) target bundleno = 5 (0x5), region = 92 }
 0x4fc   :  { %914 = vsyncpa [#allocation3], 1 }
 0x4fd   :  { %916 = vsyncpa [#allocation3 + $0x1], 1 }
 0x4fe   :  { %917 = vsyncpa [#allocation4], 1 }
 0x4ff   :  { %919 = vsyncpa [#allocation4 + $0x1], 1 }

</bundles_post_ra>
